<compile_context>
chip_gen: v5e
topology: v5e:2x2
jax: 0.10.0
libtpu: 0.0.40
codegen_flags: <defaults>
</compile_context>

<pallas_src>
import jax
import jax.numpy as jnp
from jax.experimental import pallas as pl
from jax.experimental.pallas import tpu as pltpu


_MAX_TMG = 1024  # grouped-row tile; sweep 512-2048 per chip, all fit scoped VMEM


def _round_up(a, b):
    return ((a + b - 1) // b) * b


def _sublane(dtype):
    # second-minor granularity per element width (f32:8, bf16:16, 1-byte:32)
    return {4: 8, 2: 16, 1: 32}.get(jnp.dtype(dtype).itemsize, 8)


def _head_kernel(alpha_ref, xg_ref, w_ref, b_ref, o_ref):
    # alpha_ref: (1,)               SMEM scalar (PReLU slope; 1.0 == identity)
    # xg_ref   : (tmg, group*K)     VMEM grouped-row input tile
    # w_ref    : (group*K, group*Np) VMEM block-diagonal weight (resident)
    # b_ref    : (1, group*Np)      VMEM tiled bias (resident)
    # o_ref    : (tmg, group*Np)    VMEM lane-dense output tile
    y = jnp.dot(xg_ref[...], w_ref[...], preferred_element_type=jnp.float32)
    y = y + b_ref[...]                       # f32 epilogue (broadcast over rows)
    a = alpha_ref[0]
    o_ref[...] = jnp.where(y > 0.0, y, a * y).astype(o_ref.dtype)


def pack_head_params(w, b, *, compute_dtype=None):
    """One-time packing of the head parameters (hoist out of the hot path).

    w: (dim, out_feats) (== PyTorch nn.Linear weight.T); b: (out_feats,).
    Pads out_feats up to a divisor of 128 (or a multiple of 128 when large) so
    the kernel output stays lane-dense, and builds the block-diagonal weight
    that packs `group = 128 // n_pad` consecutive rows per 128-lane output row.
    Returns (w_k, b_k, group, n_pad).
    """
    K, N = w.shape
    if N <= 128:
        n_pad = int(pl.next_power_of_2(N))          # powers of two divide 128
        group = 128 // n_pad
    else:
        n_pad = _round_up(N, 128)
        group = 1
    if n_pad != N:
        w = jnp.pad(w, ((0, 0), (0, n_pad - N)))    # zero cols -> zero outputs
        b = jnp.pad(b, (0, n_pad - N))
    kk, nk = group * K, group * n_pad
    if group > 1:
        eye = jnp.eye(group, dtype=w.dtype)
        w_k = jnp.einsum("gh,kn->gkhn", eye, w).reshape(kk, nk)
        b_k = jnp.tile(b, group).reshape(1, nk)
    else:
        w_k = w
        b_k = b.reshape(1, nk)
    if compute_dtype is not None:
        w_k = w_k.astype(compute_dtype)             # tiny + resident: cheap
    b_k = b_k.astype(jnp.float32)                   # f32 epilogue (bias+PReLU)
    return w_k, b_k, group, n_pad


def distribution_head(x, w, b, alpha, *, use_mdn=False, out_dtype=jnp.float32,
                      packed=None, max_tile=_MAX_TMG, vmem_limit_bytes=None):
    """x: (M, dim); w: (dim, out_feats) (== PyTorch weight.T); b: (out_feats,);
    alpha: scalar PReLU slope.  x is used in its incoming dtype (feed bf16 from
    upstream for the fast path; the wrapper never casts x).  Returns
    (M, out_feats) in out_dtype (default f32 == exact module semantics)."""
    M, K = x.shape
    Kw, N = w.shape
    assert K == Kw

    if packed is None:
        packed = pack_head_params(w, b, compute_dtype=x.dtype)
    w_k, b_k, group, n_pad = packed
    kk, nk = w_k.shape

    # Pad rows only to a multiple of `group` (<= group-1 rows, rare case); the
    # cdiv grid + Pallas partial-last-block handling covers the tile boundary.
    m_pad = _round_up(M, group)
    if m_pad != M:
        x = jnp.pad(x, ((0, m_pad - M), (0, 0)))
    mg = m_pad // group
    x_g = x.reshape(mg, kk)

    sub = _sublane(x.dtype)                         # 8 f32 / 16 bf16 / 32 1-byte
    tmg = min(max_tile, _round_up(mg, sub))
    grid = (pl.cdiv(mg, tmg),)
    # TODO(synk): on v7x (2 TensorCores) split small-M cases into >=2 balanced
    # grid steps so both cores get work; single-TC v5e/v6e prefer one big tile.

    alpha_eff = 1.0 if use_mdn else alpha           # use_mdn skips PReLU == slope 1
    alpha1 = jnp.asarray(alpha_eff, jnp.float32).reshape(1)

    out_g = pl.pallas_call(
        _head_kernel,
        out_shape=jax.ShapeDtypeStruct((mg, nk), out_dtype),
        grid=grid,
        in_specs=[
            # PReLU slope: whole (1,) array in SMEM (single scalar read/step)
            pl.BlockSpec(memory_space=pltpu.MemorySpace.SMEM),
            # grouped-row input tile
            pl.BlockSpec((tmg, kk), lambda i: (i, 0)),
            # full block-diagonal weight, resident across grid steps
            pl.BlockSpec((kk, nk), lambda i: (0, 0)),
            # full tiled bias row, resident
            pl.BlockSpec((1, nk), lambda i: (0, 0)),
        ],
        out_specs=pl.BlockSpec((tmg, nk), lambda i: (i, 0)),
        compiler_params=pltpu.CompilerParams(
            dimension_semantics=("parallel",),
            vmem_limit_bytes=vmem_limit_bytes,
        ),
    )(alpha1, x_g, w_k, b_k)

    # Lane-dense (mg, group*n_pad) layout is exactly row-major (m_pad, n_pad).
    out = out_g.reshape(m_pad, n_pad)
    if m_pad != M or n_pad != N:
        out = out[:M, :N]   # only copies in the ragged-M / padded-N cases
    return out


def make_distribution_head(w, b, alpha, *, use_mdn=False, x_dtype=jnp.float32,
                           **kwargs):
    """Pack the (tiny) block-diagonal weight / bias once per weight set and
    return a callable head(x); avoids per-call packing work."""
    packed = pack_head_params(w, b, compute_dtype=x_dtype)

    def apply(x):
        return distribution_head(x, w, b, alpha, use_mdn=use_mdn,
                                 packed=packed, **kwargs)

    return apply


def _reference(x, w, b, alpha, use_mdn=False):
    y = x.astype(jnp.float32) @ w.astype(jnp.float32) + b[None, :]
    if use_mdn:
        return y
    return jnp.where(y > 0.0, y, alpha * y)


if __name__ == "__main__":
    # Small shapes consistent with the module: batch=2, seq=8, dim=32, out_feats=16
    batch, seq, dim, out_feats = 2, 8, 32, 16
    key = jax.random.PRNGKey(0)
    kx, kw, kb, kx2, kw2, kb2 = jax.random.split(key, 6)

    x3 = jax.random.normal(kx, (batch, seq, dim), jnp.float32)
    # Synthetic parameters; w is stored as (dim, out_feats) == nn.Linear weight.T
    w = jax.random.normal(kw, (dim, out_feats), jnp.float32) * (1.0 / jnp.sqrt(dim))
    b = jax.random.normal(kb, (out_feats,), jnp.float32) * 0.1
    alpha = jnp.float32(0.25)  # nn.PReLU() default init

    x2 = x3.reshape(batch * seq, dim)  # flatten leading dims, as nn.Linear does

    # --- f32 path (exact semantics) -----------------------------------------
    out = jax.block_until_ready(distribution_head(x2, w, b, alpha))
    ref = _reference(x2, w, b, alpha)
    assert out.shape == (batch * seq, out_feats)
    assert jnp.allclose(out, ref, atol=1e-5, rtol=1e-5)

    # --- use_mdn=True branch (linear only) ----------------------------------
    out_mdn = jax.block_until_ready(distribution_head(x2, w, b, alpha, use_mdn=True))
    ref_mdn = _reference(x2, w, b, alpha, use_mdn=True)
    assert jnp.allclose(out_mdn, ref_mdn, atol=1e-5, rtol=1e-5)

    # --- hoisted (one-time) weight packing gives identical results ----------
    head = make_distribution_head(w, b, alpha)
    out_h = jax.block_until_ready(head(x2))
    assert jnp.allclose(out_h, ref, atol=1e-5, rtol=1e-5)

    # --- non-divisible row count: <= group-1 row pad + partial last block ---
    M2 = 1203
    xb = jax.random.normal(kx2, (M2, dim), jnp.float32)
    out_b = jax.block_until_ready(distribution_head(xb, w, b, alpha))
    assert out_b.shape == (M2, out_feats)
    assert jnp.allclose(out_b, _reference(xb, w, b, alpha), atol=1e-5, rtol=1e-5)

    # --- out_feats that does not divide 128: lane-padding path --------------
    n_odd = 10
    w_odd = jax.random.normal(kw2, (dim, n_odd), jnp.float32) * (1.0 / jnp.sqrt(dim))
    b_odd = jax.random.normal(kb2, (n_odd,), jnp.float32) * 0.1
    out_o = jax.block_until_ready(distribution_head(xb, w_odd, b_odd, alpha))
    assert out_o.shape == (M2, n_odd)
    assert jnp.allclose(out_o, _reference(xb, w_odd, b_odd, alpha), atol=1e-5, rtol=1e-5)

    # --- bf16 activations arriving from upstream (weights cast to match; ----
    # --- f32 accumulate + epilogue; results intentionally bf16-rounded) -----
    x_bf = x2.astype(jnp.bfloat16)
    out_bf = jax.block_until_ready(distribution_head(x_bf, w, b, alpha))
    ref_bf = _reference(x_bf.astype(jnp.float32),
                        w.astype(jnp.bfloat16).astype(jnp.float32), b, alpha)
    assert out_bf.shape == (batch * seq, out_feats)
    assert jnp.allclose(out_bf, ref_bf, atol=2e-2, rtol=2e-2)

    print("KERNEL_OK")
</pallas_src>

<mosaic_0001>
module attributes {stable_mosaic.version = 11 : i64} {
  func.func @_head_kernel(%arg0: i32, %arg1: memref<1xf32, #tpu.memory_space<smem>>, %arg2: memref<8x256xf32, #tpu.memory_space<vmem>>, %arg3: memref<256x128xf32, #tpu.memory_space<vmem>>, %arg4: memref<1x128xf32, #tpu.memory_space<vmem>>, %arg5: memref<8x128xf32, #tpu.memory_space<vmem>>) attributes {dimension_semantics = [#tpu.dimension_semantics<parallel>], iteration_bounds = array<i64: 1>, scalar_prefetch = 0 : i64, scratch_operands = 0 : i64, tpu.core_type = #tpu.core_type<tc>, window_params = [{transform_indices = @transform_0, window_bounds = array<i64: 1>}, {transform_indices = @transform_1, window_bounds = array<i64: 8, 256>}, {pipeline_mode = #tpu.pipeline_mode<synchronous>, transform_indices = @transform_2, window_bounds = array<i64: 256, 128>}, {pipeline_mode = #tpu.pipeline_mode<synchronous>, transform_indices = @transform_3, window_bounds = array<i64: 1, 128>}, {transform_indices = @transform_4, window_bounds = array<i64: 8, 128>}]} {
    %c0 = arith.constant 0 : index
    %c0_0 = arith.constant 0 : index
    %0 = vector.load %arg2[%c0, %c0_0] : memref<8x256xf32, #tpu.memory_space<vmem>>, vector<8x256xf32>
    %c0_1 = arith.constant 0 : index
    %c0_2 = arith.constant 0 : index
    %1 = vector.load %arg3[%c0_1, %c0_2] : memref<256x128xf32, #tpu.memory_space<vmem>>, vector<256x128xf32>
    %cst = arith.constant dense<0.000000e+00> : vector<8x128xf32>
    %2 = tpu.matmul %0, %1, %cst {dimension_numbers = #tpu.dot_dimension_numbers<[1], [0], [0], [1], [0, 0, 1, 1], [], []>} : vector<8x256xf32>, vector<256x128xf32>, vector<8x128xf32> -> vector<8x128xf32>
    %c0_3 = arith.constant 0 : index
    %c0_4 = arith.constant 0 : index
    %3 = vector.load %arg4[%c0_3, %c0_4] : memref<1x128xf32, #tpu.memory_space<vmem>>, vector<1x128xf32>
    %4 = vector.broadcast %3 : vector<1x128xf32> to vector<8x128xf32>
    %5 = arith.addf %2, %4 : vector<8x128xf32>
    %c0_5 = arith.constant 0 : index
    %6 = memref.load %arg1[%c0_5] : memref<1xf32, #tpu.memory_space<smem>>
    %cst_6 = arith.constant 0.000000e+00 : f32
    %7 = vector.broadcast %cst_6 : f32 to vector<8x128xf32>
    %8 = arith.cmpf ogt, %5, %7 : vector<8x128xf32>
    %9 = vector.broadcast %6 : f32 to vector<8x128xf32>
    %10 = arith.mulf %9, %5 : vector<8x128xf32>
    %11 = arith.select %8, %5, %10 : vector<8x128xi1>, vector<8x128xf32>
    %c0_7 = arith.constant 0 : index
    %c0_8 = arith.constant 0 : index
    %12 = vector.load %arg5[%c0_7, %c0_8] : memref<8x128xf32, #tpu.memory_space<vmem>>, vector<8x128xf32>
    tpu.vector_store %arg5[%c0_7, %c0_8], %11 {strides = array<i32>} : memref<8x128xf32, #tpu.memory_space<vmem>>, vector<8x128xf32>,
    return
  }
  func.func @transform_0(%arg0: i32) -> i32 {
    %c0_i32 = arith.constant 0 : i32
    %c0_i32_0 = arith.constant 0 : i32
    return %c0_i32 : i32
  }
  func.func @transform_1(%arg0: i32) -> (i32, i32) {
    %c0_i32 = arith.constant 0 : i32
    %c0_i32_0 = arith.constant 0 : i32
    return %arg0, %c0_i32 : i32, i32
  }
  func.func @transform_2(%arg0: i32) -> (i32, i32) {
    %c0_i32 = arith.constant 0 : i32
    %c0_i32_0 = arith.constant 0 : i32
    %c0_i32_1 = arith.constant 0 : i32
    return %c0_i32, %c0_i32_0 : i32, i32
  }
  func.func @transform_3(%arg0: i32) -> (i32, i32) {
    %c0_i32 = arith.constant 0 : i32
    %c0_i32_0 = arith.constant 0 : i32
    %c0_i32_1 = arith.constant 0 : i32
    return %c0_i32, %c0_i32_0 : i32, i32
  }
  func.func @transform_4(%arg0: i32) -> (i32, i32) {
    %c0_i32 = arith.constant 0 : i32
    %c0_i32_0 = arith.constant 0 : i32
    return %arg0, %c0_i32 : i32, i32
  }
}

</mosaic_0001>

<bundles_post_ra>
// kernel: tpu_custom_call.1
= control target key start
LH: loop header
LB: loop body
LE: loop exit
PB: predicated region body
PF: predicated region fallthrough
CT: control target
= control target key end

     0   :  { %10 = vsyncpa [#allocation4], 0  ;;  %s309_s0 = inlined_call_operand.<no memory space> [shape: f32[1], index: 0, kind: input, shape index: {}]   ;;  %s310_s1 = inlined_call_operand.hbm [shape: f32[2,256], index: 1, kind: input, shape index: {}]   ;;  %s311_s2 = inlined_call_operand.hbm [shape: f32[256,128], index: 2, kind: input, shape index: {}]   ;;  %s312_s3 = inlined_call_operand.vmem [shape: f32[1,128], index: 3, kind: input, shape index: {}]   ;;  %s313_s4 = inlined_call_operand.hbm [shape: f32[2,128], index: 4, kind: output, shape index: {}]  }
   0x1   :  { %11 = vsyncpa [#allocation7], 0 }
   0x2   :  { %12 = vsyncpa [#allocation5], 0 }
   0x3   :  { %18 = vsyncadd [#allocation4], 192  ;;  %s19_s17 = sshll.u32 %s310_s1, 4  ;;  %s260_s18 = smov [#allocation3]   ;;  %s20_s17 = int_to_ptr.hbm [resolvable:$true] %s19_s17 }
   0x4   :  { %s21_s19 = sshll.u32 %s260_s18, 4  ;;  %s32_s22 = sshll.u32 %s311_s2, 4  ;;  %s22_s19 = int_to_ptr.vmem [resolvable:$true] %s21_s19  ;;  %s33_s22 = int_to_ptr.hbm [resolvable:$true] %s32_s22 }
   0x5   :  { %s261_s23 = smov 64   ;;  %s262_s24 = smov 4  }
   0x6   :  { %27 = dma.hbm_to_vmem [thread:$0]  %s20_s17, 64, %s22_s19, [#allocation4], %s261_s23, %s261_s23, %s262_s24  }
   0x7   :  { %s263_s25 = smov [#allocation6]   ;;  %s264_s27 = smov 128  }
   0x8   :  { %s34_s26 = sshll.u32 %s263_s25, 4  ;;  %s265_s28 = smov 8   ;;  %s35_s26 = int_to_ptr.vmem [resolvable:$true] %s34_s26 }
   0x9   :  { %40 = dma.hbm_to_vmem [thread:$0]  %s33_s22, 4096, %s35_s26, [#allocation7], %s264_s27, %s264_s27, %s265_s28  }
   0xa   :  { %254 = dma.done.wait [#allocation4], 256  }
   0xb   :  { %255 = vsyncadd [#allocation4], 4294967040 }
   0xc   :  { %256 = dma.done.wait [#allocation7], 4096  }
   0xd   :  { %257 = vsyncadd [#allocation7], 4294963200  ;;  %v70_v0 = vld [vmem:[#allocation6 + $0x78] sm:$0xff]  ;;  %v69_v1 = vld [vmem:[#allocation6 + $0x70] sm:$0xff]  ;;  %v148_v42 = vstv %s309_s0 }
   0xe   :  { %v86_v2 = vld [vmem:[#allocation6 + $0xf8] sm:$0xff]  ;;  %106 = vmatpush.msra.mxu0 %v70_v0  ;;  %v85_v3 = vld [vmem:[#allocation6 + $0xf0] sm:$0xff]  ;;  %v68_v4 = vld [vmem:[#allocation6 + $0x68] sm:$0xff] }
   0xf   :  { %126 = vmatpush.msra.mxu1 %v86_v2  ;;  %v84_v5 = vld [vmem:[#allocation6 + $0xe8] sm:$0xff]  ;;  %v67_v6 = vld [vmem:[#allocation6 + $0x60] sm:$0xff]  ;;  %v66_v8 = vld [vmem:[#allocation6 + $0x58] sm:$0xff] }
  0x10   :  { %107 = vmatpush.msra.mxu0 %v69_v1  ;;  %v83_v7 = vld [vmem:[#allocation6 + $0xe0] sm:$0xff]  ;;  %v82_v9 = vld [vmem:[#allocation6 + $0xd8] sm:$0xff]  ;;  %v65_v10 = vld [vmem:[#allocation6 + $0x50] sm:$0xff] }
  0x11   :  { %127 = vmatpush.msra.mxu1 %v85_v3  ;;  %v81_v11 = vld [vmem:[#allocation6 + $0xd0] sm:$0xff]  ;;  %v64_v12 = vld [vmem:[#allocation6 + $0x48] sm:$0xff]  ;;  %v53_v16 = vld [vmem:[#allocation3 + $0x8] sm:$0xf] }
  0x12   :  { %108 = vmatpush.msra.mxu0 %v68_v4  ;;  %v80_v13 = vld [vmem:[#allocation6 + $0xc8] sm:$0xff]  ;;  %v51_v14 = vld [vmem:[#allocation3] sm:$0xf]  ;;  %v52_v15 = vld [vmem:[#allocation3 + $0x4] sm:$0xf] }
  0x13   :  { %128 = vmatpush.msra.mxu1 %v84_v5  ;;  %v54_v17 = vld [vmem:[#allocation3 + $0xc] sm:$0xf]  ;;  %95 = vst [vmem:[#allocation1] ss:$4 sm:$0xff] %v51_v14  ;;  %v63_v18 = vld [vmem:[#allocation6 + $0x40] sm:$0xff]  ;;  %v61_v22 = vld [vmem:[#allocation6 + $0x30] sm:$0xff] }
  0x14   :  { %109 = vmatpush.msra.mxu0 %v67_v6  ;;  %v79_v19 = vld [vmem:[#allocation6 + $0xc0] sm:$0xff]  ;;  %97 = vst [vmem:[#allocation1 + $0x1] ss:$4 sm:$0xff] %v52_v15  ;;  %v62_v20 = vld [vmem:[#allocation6 + $0x38] sm:$0xff]  ;;  %v77_v23 = vld [vmem:[#allocation6 + $0xb0] sm:$0xff] }
  0x15   :  { %129 = vmatpush.msra.mxu1 %v83_v7  ;;  %99 = vst [vmem:[#allocation1 + $0x2] ss:$4 sm:$0xff] %v53_v16  ;;  %v78_v21 = vld [vmem:[#allocation6 + $0xb8] sm:$0xff]  ;;  %v60_v24 = vld [vmem:[#allocation6 + $0x28] sm:$0xff]  ;;  %v59_v26 = vld [vmem:[#allocation6 + $0x20] sm:$0xff] }
  0x16   :  { %110 = vmatpush.msra.mxu0 %v66_v8  ;;  %101 = vst [vmem:[#allocation1 + $0x3] ss:$4 sm:$0xff] %v54_v17  ;;  %v76_v25 = vld [vmem:[#allocation6 + $0xa8] sm:$0xff]  ;;  %v75_v27 = vld [vmem:[#allocation6 + $0xa0] sm:$0xff]  ;;  %v58_v28 = vld [vmem:[#allocation6 + $0x18] sm:$0xff] }
  0x17   :  { %130 = vmatpush.msra.mxu1 %v82_v9  ;;  %v74_v29 = vld [vmem:[#allocation6 + $0x98] sm:$0xff]  ;;  %v57_v30 = vld [vmem:[#allocation6 + $0x10] sm:$0xff]  ;;  %v56_v32 = vld [vmem:[#allocation6 + $0x8] sm:$0xff] }
  0x18   :  { %111 = vmatpush.msra.mxu0 %v65_v10  ;;  %v73_v31 = vld [vmem:[#allocation6 + $0x90] sm:$0xff]  ;;  %v72_v33 = vld [vmem:[#allocation6 + $0x88] sm:$0xff]  ;;  %v55_v34 = vld [vmem:[#allocation6] sm:$0xff] }
  0x19   :  { %131 = vmatpush.msra.mxu1 %v81_v11  ;;  %v71_v35 = vld [vmem:[#allocation6 + $0x80] sm:$0xff]  ;;  %v181_v38 = vld [vmem:[%s312_s3] ss:$0 sm:$0xff] }
  0x1a   :  { %112 = vmatpush.msra.mxu0 %v64_v12 }
  0x1b   :  { %132 = vmatpush.msra.mxu1 %v80_v13 }
  0x1c   :  { %113 = vmatpush.msra.mxu0 %v63_v18 }
  0x1d   :  { %133 = vmatpush.msra.mxu1 %v79_v19  ;;  %v102_v36 = vld.sshfl [vmem:[#allocation1] sm:$0xff pattern:$0x73625140]  ;;  %v103_v37 = vld.sshfl [vmem:[#allocation1 + $0x8] sm:$0xff pattern:$0x73625140] }
  0x1e   :  { %114 = vmatpush.msra.mxu0 %v62_v20 }
  0x1f   :  { %134 = vmatpush.msra.mxu1 %v78_v21 }
  0x20   :  { %115 = vmatpush.msra.mxu0 %v61_v22 }
  0x21   :  { %135 = vmatpush.msra.mxu1 %v77_v23 }
  0x22   :  { %116 = vmatpush.msra.mxu0 %v60_v24 }
  0x23   :  { %136 = vmatpush.msra.mxu1 %v76_v25 }
  0x24   :  { %117 = vmatpush.msra.mxu0 %v59_v26 }
  0x25   :  { %137 = vmatpush.msra.mxu1 %v75_v27 }
  0x26   :  { %118 = vmatpush.msra.mxu0 %v58_v28 }
  0x27   :  { %138 = vmatpush.msra.mxu1 %v74_v29 }
  0x28   :  { %119 = vmatpush.msra.mxu0 %v57_v30 }
  0x29   :  { %139 = vmatpush.msra.mxu1 %v73_v31 }
  0x2a   :  { %120 = vmatpush.msra.mxu0 %v56_v32 }
  0x2b   :  { %140 = vmatpush.msra.mxu1 %v72_v33 }
  0x2c   :  { %121 = vmatpush.msra.mxu0 %v55_v34 }
  0x2d   :  { %141 = vmatpush.msra.mxu1 %v71_v35  ;;  %122 = vmatmul.f32.vlgmr.msra.gmra.mxu0 %v102_v36 }
  0x2e   :  { %142 = vmatmul.f32.vlgmr.msra.gmra.mxu1 %v103_v37 }
  0xaa   :  { %v123_v39 = vpop.f32.mrf.mxu0 }
  0xab   :  { %v143_v40 = vpop.f32.mrf.mxu1  ;;  %v124_v41 = vadd.f32 %v181_v38, %v123_v39 }
  0xad   :  { %v144_v43 = vadd.f32 %v143_v40, %v124_v41 }
  0xaf   :  { %vm147_vm0 = vcmp.gt.f32.partialorder %v144_v43, 0.0  ;;  %v149_v44 = vmul.f32 %v148_v42, %v144_v43 }
  0xb1   :  { %v150_v45 = vsel %vm147_vm0, %v144_v43, %v149_v44 }
  0xb2   :  { %151 = vst [vmem:[#allocation8] sm:$0xff] %v150_v45 }
  0xb3   :  { %155 = vsyncadd [#allocation5], 96  ;;  %s158_s7 = sshll.u32 %s313_s4, 4  ;;  %s266_s8 = smov [#allocation8]   ;;  %s159_s7 = int_to_ptr.hbm [resolvable:$true] %s158_s7 }
  0xb4   :  { %s156_s9 = sshll.u32 %s266_s8, 4  ;;  %s267_s3 = smov 32   ;;  %s157_s9 = int_to_ptr.vmem [resolvable:$true] %s156_s9 }
  0xb5   :  { %s268_s10 = smov 2  }
  0xb6   :  { %164 = dma.vmem_to_hbm [thread:$0]  %s157_s9, 32, %s159_s7, [#allocation5], %s267_s3, %s267_s3, %s268_s10  }
  0xb7   :  { %258 = dma.done.wait [#allocation5], 128  }
  0xb8   :  { %259 = vsyncadd [#allocation5], 4294967168 }
  0xb9   :  { %169 = vsyncpa [#allocation4], 1 }
  0xba   :  { %170 = vsyncpa [#allocation7], 1 }
  0xbb   :  { %171 = vsyncpa [#allocation5], 1 }

</bundles_post_ra>
